<compile_context>
chip_gen: v7x
topology: tpu7x:2x2x1
jax: 0.10.0
libtpu: 0.0.40
codegen_flags: <defaults>
</compile_context>

<pallas_src>
import math
from functools import partial

import jax
import jax.numpy as jnp
from jax.experimental import pallas as pl
from jax.experimental.pallas import tpu as pltpu

SIGMA = 0.1
BG_VAR = 1.0
EPS = 1e-6  # torch.nn.GaussianNLLLoss default eps


# --------------------------------------------------------------------------- #
# Kernel
# --------------------------------------------------------------------------- #
def _loss_vae_kernel(xh_ref, x_ref, m_ref, mu_ref, lv_ref,   # inputs
                     out_ref,                                # output (1, 8, 128)
                     rec_acc,                                # VMEM (1, 1) f32 scratch
                     *, fg_var, bg_var, binary_mask):
    j = pl.program_id(1)                                     # feature (reduction) axis

    @pl.when(j == 0)
    def _init():
        rec_acc[...] = jnp.zeros_like(rec_acc)

    xh = xh_ref[...].astype(jnp.float32)                     # (tb, C, tw)
    xx = x_ref[...].astype(jnp.float32)                      # (tb, C, tw)
    m = m_ref[...].astype(jnp.float32)                       # (tb, 1, tw) -> bcast over C
    d = xh - xx
    d2 = d * d

    if binary_mask:
        # mask guaranteed to be {0, 1}: replace per-element log + divide (EUP)
        # with precomputed constants + VPU selects.  Identical semantics for
        # binary masks.
        log_fg = math.log(max(fg_var, EPS))
        log_bg = math.log(max(bg_var, EPS))
        inv_fg = 1.0 / max(fg_var, EPS)
        inv_bg = 1.0 / max(bg_var, EPS)
        is_fg = m != 0.0
        logv = jnp.where(is_fg, jnp.float32(log_fg), jnp.float32(log_bg))
        invv = jnp.where(is_fg, jnp.float32(inv_fg), jnp.float32(inv_bg))
        nll = 0.5 * (logv + d2 * invv)                       # (tb, C, tw)
    else:
        # Exact PyTorch formula (supports soft masks in (0, 1)).
        var = (m == 0.0).astype(jnp.float32) * bg_var + m * fg_var
        var = jnp.maximum(var, EPS)                          # torch clamps var to eps
        nll = 0.5 * (jnp.log(var) + d2 / var)                # (tb, C, tw)

    rec_acc[...] = rec_acc[...] + jnp.sum(nll)               # f32 partial sum

    @pl.when(j == pl.num_programs(1) - 1)
    def _finalize():
        # KL for this batch tile, computed exactly once (last feature step).
        mu = mu_ref[...].astype(jnp.float32)                 # (tb, L)
        lv = lv_ref[...].astype(jnp.float32)                 # (tb, L)
        kl_p = 0.5 * jnp.sum(jnp.exp(lv) + mu * mu - 1.0 - lv)
        rec_p = rec_acc[0, 0]
        lane = jax.lax.broadcasted_iota(jnp.int32, (1, 8, 128), 2)
        out_ref[...] = jnp.where(lane == 0, kl_p,
                                 jnp.where(lane == 1, rec_p, 0.0))


# --------------------------------------------------------------------------- #
# Tiling helpers
# --------------------------------------------------------------------------- #
def _pick_tile_w(hw, target=2048):
    """Largest multiple of 128 dividing hw, capped at `target` (else full dim)."""
    if hw % 128 != 0:
        return hw
    best, t = 128, 128
    while t <= min(hw, target):
        if hw % t == 0:
            best = t
        t += 128
    return best


def _pick_tile_b(b, row_bytes, target_bytes=2 << 20):
    """Batch tile: divisor of b, multiple of 8 (or == b), block <= ~target_bytes.
    Prefer >= 2 batch tiles when b >= 16 so the 'parallel' axis can shard on v7x."""
    if b <= 8 or b % 8 != 0:
        return b
    cap = max(8, target_bytes // max(row_bytes, 1))
    upper = min(b, cap)
    if b >= 16:
        upper = min(upper, b // 2)
    best, t = 8, 8
    while t <= upper:
        if b % t == 0:
            best = t
        t += 8
    return best


# --------------------------------------------------------------------------- #
# Wrapper
# --------------------------------------------------------------------------- #
def loss_vae(x_hat, x, mu, log_var, mask, sigma=SIGMA, bg_var=BG_VAR,
             *, binary_mask=False):
    """Returns (loss, kl_loss, recon_loss) — LossVAE.forward with pred_var=None.

    Set binary_mask=True only if mask is guaranteed to contain {0, 1} values
    (enables the EUP-free select path)."""
    B, C, H, W = x_hat.shape
    assert C == 4, "LossVAE assumes 4 channels (mask.repeat(1, 4, 1, 1))"
    assert x.shape == x_hat.shape
    assert mask.shape == (B, 1, H, W)
    L = mu.shape[-1]
    HW = H * W

    if mask.dtype == jnp.bool_:
        mask = mask.astype(jnp.float32)

    # Lane-dense slabs; no dtype upcast (bf16 stays bf16 in HBM), no mask broadcast.
    xh3 = x_hat.reshape(B, C, HW)
    x3 = x.reshape(B, C, HW)
    m3 = mask.reshape(B, 1, HW)
    mu2 = mu.reshape(B, L)
    lv2 = log_var.reshape(B, L)

    item = x_hat.dtype.itemsize
    m_item = mask.dtype.itemsize
    s_item = mu.dtype.itemsize

    tw = _pick_tile_w(HW)
    tb = _pick_tile_b(B, C * tw * item)
    n_b = B // tb
    n_w = HW // tw

    fg_var = float(sigma) * float(sigma)
    bgv = float(bg_var)

    kernel = partial(_loss_vae_kernel, fg_var=fg_var, bg_var=bgv,
                     binary_mask=bool(binary_mask))

    # VMEM budget (double-buffered inputs + padded mask + headroom), v7x-safe cap.
    step_bytes = 2 * tb * C * tw * item + tb * tw * m_item + 2 * tb * L * s_item
    vmem_limit = int(min(48 << 20, max(16 << 20, 6 * step_bytes + (4 << 20))))

    flops = 8 * B * C * HW + 6 * B * L
    transcendentals = (0 if binary_mask else B * HW) + B * L
    bytes_accessed = (2 * B * C * HW * item + B * HW * m_item
                      + 2 * B * L * s_item + n_b * 8 * 128 * 4)

    out = pl.pallas_call(
        kernel,
        out_shape=jax.ShapeDtypeStruct((n_b, 8, 128), jnp.float32),
        grid_spec=pltpu.PrefetchScalarGridSpec(
            num_scalar_prefetch=0,
            grid=(n_b, n_w),
            in_specs=[
                pl.BlockSpec((tb, C, tw), lambda i, j: (i, 0, j)),   # x_hat
                pl.BlockSpec((tb, C, tw), lambda i, j: (i, 0, j)),   # x
                pl.BlockSpec((tb, 1, tw), lambda i, j: (i, 0, j)),   # mask (1 ch)
                pl.BlockSpec((tb, L), lambda i, j: (i, 0)),          # mu
                pl.BlockSpec((tb, L), lambda i, j: (i, 0)),          # log_var
            ],
            out_specs=pl.BlockSpec((1, 8, 128), lambda i, j: (i, 0, 0)),
            scratch_shapes=[pltpu.VMEM((1, 1), jnp.float32)],
        ),
        compiler_params=pltpu.CompilerParams(
            dimension_semantics=("parallel", "arbitrary"),
            vmem_limit_bytes=vmem_limit),
        cost_estimate=pl.CostEstimate(flops=flops,
                                      transcendentals=transcendentals,
                                      bytes_accessed=bytes_accessed),
    )(xh3, x3, m3, mu2, lv2)

    inv_b = 1.0 / float(B)
    kl = jnp.sum(out[:, 0, 0]) * inv_b      # mean over batch of per-sample KL sums
    rec = jnp.sum(out[:, 0, 1]) * inv_b     # mean over batch of per-sample NLL sums
    loss = kl + rec
    return loss, kl, rec


# --------------------------------------------------------------------------- #
# Pure-JAX reference (matches the PyTorch module, pred_var=None)
# --------------------------------------------------------------------------- #
def _reference(x_hat, x, mu, log_var, mask, sigma=SIGMA, bg_var=BG_VAR):
    mu = mu.astype(jnp.float32)
    log_var = log_var.astype(jnp.float32)
    kl = jnp.mean(0.5 * jnp.sum(jnp.exp(log_var) + mu ** 2 - 1.0 - log_var, -1))
    xh = x_hat.astype(jnp.float32)
    xx = x.astype(jnp.float32)
    m = jnp.broadcast_to(mask, x_hat.shape).astype(jnp.float32)
    var = (m == 0).astype(jnp.float32) * bg_var + m * (sigma * sigma)
    var = jnp.maximum(var, EPS)
    nll = 0.5 * (jnp.log(var) + (xh - xx) ** 2 / var)
    rec = jnp.mean(jnp.sum(nll.reshape(x.shape[0], -1), axis=1))
    return kl + rec, kl, rec


if __name__ == "__main__":
    def _check(B, C, H, W, L, seed=0):
        key = jax.random.PRNGKey(seed)
        k1, k2, k3, k4, k5 = jax.random.split(key, 5)
        x = jax.random.normal(k1, (B, C, H, W), jnp.float32)
        x_hat = x + 0.2 * jax.random.normal(k2, (B, C, H, W), jnp.float32)
        mu = jax.random.normal(k3, (B, L), jnp.float32)
        log_var = 0.1 * jax.random.normal(k4, (B, L), jnp.float32)
        mask = (jax.random.uniform(k5, (B, 1, H, W)) > 0.5).astype(jnp.float32)

        loss_r, kl_r, rec_r = _reference(x_hat, x, mu, log_var, mask)
        for bm in (False, True):
            loss, kl, rec = loss_vae(x_hat, x, mu, log_var, mask, binary_mask=bm)
            jax.block_until_ready((loss, kl, rec))
            assert jnp.allclose(kl, kl_r, rtol=2e-5, atol=1e-3), (bm, kl, kl_r)
            assert jnp.allclose(rec, rec_r, rtol=2e-5, atol=1e-3), (bm, rec, rec_r)
            assert jnp.allclose(loss, loss_r, rtol=2e-5, atol=1e-3), (bm, loss, loss_r)

    # Small shape from the spec: single-block grid (1, 1).
    _check(2, 4, 16, 16, 32, seed=0)
    # Slightly larger shape: exercises grid (2, 2) — batch tiles ("parallel")
    # plus feature-axis accumulation ("arbitrary").
    _check(16, 4, 64, 64, 32, seed=1)

    print("KERNEL_OK")
</pallas_src>

<mosaic_0001>
module attributes {stable_mosaic.version = 11 : i64} {
  func.func @_loss_vae_kernel(%arg0: i32, %arg1: i32, %arg2: memref<2x4x256xf32, #tpu.memory_space<vmem>>, %arg3: memref<2x4x256xf32, #tpu.memory_space<vmem>>, %arg4: memref<2x1x256xf32, #tpu.memory_space<vmem>>, %arg5: memref<2x32xf32, #tpu.memory_space<vmem>>, %arg6: memref<2x32xf32, #tpu.memory_space<vmem>>, %arg7: memref<1x8x128xf32, #tpu.memory_space<vmem>>, %arg8: memref<1x1xf32, #tpu.memory_space<vmem>>) attributes {dimension_semantics = [#tpu.dimension_semantics<parallel>, #tpu.dimension_semantics<arbitrary>], iteration_bounds = array<i64: 1, 1>, scalar_prefetch = 0 : i64, scratch_operands = 1 : i64, tpu.core_type = #tpu.core_type<tc>, window_params = [{transform_indices = @transform_0, window_bounds = array<i64: 2, 4, 256>}, {transform_indices = @transform_1, window_bounds = array<i64: 2, 4, 256>}, {transform_indices = @transform_2, window_bounds = array<i64: 2, 1, 256>}, {transform_indices = @transform_3, window_bounds = array<i64: 2, 32>}, {transform_indices = @transform_4, window_bounds = array<i64: 2, 32>}, {transform_indices = @transform_5, window_bounds = array<i64: 1, 8, 128>}]} {
    %c0_i32 = arith.constant 0 : i32
    %0 = arith.cmpi eq, %arg1, %c0_i32 : i32
    %1 = arith.extui %0 : i1 to i32
    %c0_i32_0 = arith.constant 0 : i32
    %2 = arith.cmpi ne, %1, %c0_i32_0 : i32
    scf.if %2 {
      %cst_20 = arith.constant 0.000000e+00 : f32
      %37 = vector.broadcast %cst_20 : f32 to vector<1x1xf32>
      %c0_21 = arith.constant 0 : index
      %c0_22 = arith.constant 0 : index
      %38 = vector.load %arg8[%c0_21, %c0_22] : memref<1x1xf32, #tpu.memory_space<vmem>>, vector<1x1xf32>
      tpu.vector_store %arg8[%c0_21, %c0_22], %37 {strides = array<i32>} : memref<1x1xf32, #tpu.memory_space<vmem>>, vector<1x1xf32>,
    } else {
    }
    %c0 = arith.constant 0 : index
    %c0_1 = arith.constant 0 : index
    %c0_2 = arith.constant 0 : index
    %3 = vector.load %arg2[%c0, %c0_1, %c0_2] : memref<2x4x256xf32, #tpu.memory_space<vmem>>, vector<2x4x256xf32>
    %c0_3 = arith.constant 0 : index
    %c0_4 = arith.constant 0 : index
    %c0_5 = arith.constant 0 : index
    %4 = vector.load %arg3[%c0_3, %c0_4, %c0_5] : memref<2x4x256xf32, #tpu.memory_space<vmem>>, vector<2x4x256xf32>
    %c0_6 = arith.constant 0 : index
    %c0_7 = arith.constant 0 : index
    %c0_8 = arith.constant 0 : index
    %5 = vector.load %arg4[%c0_6, %c0_7, %c0_8] : memref<2x1x256xf32, #tpu.memory_space<vmem>>, vector<2x1x256xf32>
    %6 = arith.subf %3, %4 : vector<2x4x256xf32>
    %7 = arith.mulf %6, %6 : vector<2x4x256xf32>
    %cst = arith.constant 0.000000e+00 : f32
    %8 = vector.broadcast %cst : f32 to vector<2x1x256xf32>
    %9 = arith.cmpf oeq, %5, %8 : vector<2x1x256xf32>
    %10 = arith.extui %9 : vector<2x1x256xi1> to vector<2x1x256xi32>
    %11 = arith.sitofp %10 : vector<2x1x256xi32> to vector<2x1x256xf32>
    %cst_9 = arith.constant 1.000000e+00 : f32
    %12 = vector.broadcast %cst_9 : f32 to vector<2x1x256xf32>
    %13 = arith.mulf %11, %12 : vector<2x1x256xf32>
    %cst_10 = arith.constant 0.00999999977 : f32
    %14 = vector.broadcast %cst_10 : f32 to vector<2x1x256xf32>
    %15 = arith.mulf %5, %14 : vector<2x1x256xf32>
    %16 = arith.addf %13, %15 : vector<2x1x256xf32>
    %cst_11 = arith.constant 9.99999997E-7 : f32
    %17 = vector.broadcast %cst_11 : f32 to vector<2x1x256xf32>
    %18 = arith.maximumf %16, %17 : vector<2x1x256xf32>
    %19 = math.log %18 : vector<2x1x256xf32>
    %20 = vector.broadcast %18 : vector<2x1x256xf32> to vector<2x4x256xf32>
    %21 = arith.divf %7, %20 : vector<2x4x256xf32>
    %22 = vector.broadcast %19 : vector<2x1x256xf32> to vector<2x4x256xf32>
    %23 = arith.addf %22, %21 : vector<2x4x256xf32>
    %cst_12 = arith.constant 5.000000e-01 : f32
    %24 = vector.broadcast %cst_12 : f32 to vector<2x4x256xf32>
    %25 = arith.mulf %24, %23 : vector<2x4x256xf32>
    %c0_13 = arith.constant 0 : index
    %c0_14 = arith.constant 0 : index
    %26 = vector.load %arg8[%c0_13, %c0_14] : memref<1x1xf32, #tpu.memory_space<vmem>>, vector<1x1xf32>
    %27 = vector.shape_cast %25 : vector<2x4x256xf32> to vector<1x2x4x256xf32>
    %cst_15 = arith.constant dense<0.000000e+00> : vector<1xf32>
    %28 = vector.multi_reduction <add>, %27, %cst_15 [1, 2, 3] : vector<1x2x4x256xf32> to vector<1xf32>
    %29 = vector.shape_cast %28 : vector<1xf32> to vector<1x1x1x1xf32>
    %30 = vector.extract %29[0, 0, 0, 0] : f32 from vector<1x1x1x1xf32>
    %31 = vector.broadcast %30 : f32 to vector<1x1xf32>
    %32 = arith.addf %26, %31 : vector<1x1xf32>
    %c0_16 = arith.constant 0 : index
    %c0_17 = arith.constant 0 : index
    %33 = vector.load %arg8[%c0_16, %c0_17] : memref<1x1xf32, #tpu.memory_space<vmem>>, vector<1x1xf32>
    tpu.vector_store %arg8[%c0_16, %c0_17], %32 {strides = array<i32>} : memref<1x1xf32, #tpu.memory_space<vmem>>, vector<1x1xf32>,
    %c0_i32_18 = arith.constant 0 : i32
    %34 = arith.cmpi eq, %arg1, %c0_i32_18 : i32
    %35 = arith.extui %34 : i1 to i32
    %c0_i32_19 = arith.constant 0 : i32
    %36 = arith.cmpi ne, %35, %c0_i32_19 : i32
    scf.if %36 {
      %c0_20 = arith.constant 0 : index
      %c0_21 = arith.constant 0 : index
      %37 = vector.load %arg5[%c0_20, %c0_21] : memref<2x32xf32, #tpu.memory_space<vmem>>, vector<2x32xf32>
      %c0_22 = arith.constant 0 : index
      %c0_23 = arith.constant 0 : index
      %38 = vector.load %arg6[%c0_22, %c0_23] : memref<2x32xf32, #tpu.memory_space<vmem>>, vector<2x32xf32>
      %39 = math.exp %38 : vector<2x32xf32>
      %40 = arith.mulf %37, %37 : vector<2x32xf32>
      %41 = arith.addf %39, %40 : vector<2x32xf32>
      %cst_24 = arith.constant 1.000000e+00 : f32
      %42 = vector.broadcast %cst_24 : f32 to vector<2x32xf32>
      %43 = arith.subf %41, %42 : vector<2x32xf32>
      %44 = arith.subf %43, %38 : vector<2x32xf32>
      %45 = vector.shape_cast %44 : vector<2x32xf32> to vector<1x2x32xf32>
      %cst_25 = arith.constant dense<0.000000e+00> : vector<1xf32>
      %46 = vector.multi_reduction <add>, %45, %cst_25 [1, 2] : vector<1x2x32xf32> to vector<1xf32>
      %47 = vector.shape_cast %46 : vector<1xf32> to vector<1x1x1xf32>
      %48 = vector.extract %47[0, 0, 0] : f32 from vector<1x1x1xf32>
      %cst_26 = arith.constant 5.000000e-01 : f32
      %49 = arith.mulf %cst_26, %48 : f32
      %c0_27 = arith.constant 0 : index
      %c0_28 = arith.constant 0 : index
      %50 = vector.load %arg8[%c0_27, %c0_28] : memref<1x1xf32, #tpu.memory_space<vmem>>, vector<1x1xf32>
      %51 = vector.extract %50[0, 0] : f32 from vector<1x1xf32>
      %52 = tpu.iota {dimensions = array<i32: 2>} : vector<1x8x128xi32>
      %c0_i32_29 = arith.constant 0 : i32
      %53 = vector.broadcast %c0_i32_29 : i32 to vector<1x8x128xi32>
      %54 = arith.cmpi eq, %52, %53 : vector<1x8x128xi32>
      %c1_i32 = arith.constant 1 : i32
      %55 = vector.broadcast %c1_i32 : i32 to vector<1x8x128xi32>
      %56 = arith.cmpi eq, %52, %55 : vector<1x8x128xi32>
      %cst_30 = arith.constant 0.000000e+00 : f32
      %57 = vector.broadcast %51 : f32 to vector<1x8x128xf32>
      %58 = vector.broadcast %cst_30 : f32 to vector<1x8x128xf32>
      %59 = arith.select %56, %57, %58 : vector<1x8x128xi1>, vector<1x8x128xf32>
      %60 = vector.broadcast %49 : f32 to vector<1x8x128xf32>
      %61 = arith.select %54, %60, %59 : vector<1x8x128xi1>, vector<1x8x128xf32>
      %c0_31 = arith.constant 0 : index
      %c0_32 = arith.constant 0 : index
      %c0_33 = arith.constant 0 : index
      %62 = vector.load %arg7[%c0_31, %c0_32, %c0_33] : memref<1x8x128xf32, #tpu.memory_space<vmem>>, vector<1x8x128xf32>
      tpu.vector_store %arg7[%c0_31, %c0_32, %c0_33], %61 {strides = array<i32>} : memref<1x8x128xf32, #tpu.memory_space<vmem>>, vector<1x8x128xf32>,
    } else {
    }
    return
  }
  func.func @transform_0(%arg0: i32, %arg1: i32) -> (i32, i32, i32) {
    %c0_i32 = arith.constant 0 : i32
    %c0_i32_0 = arith.constant 0 : i32
    return %arg0, %c0_i32, %arg1 : i32, i32, i32
  }
  func.func @transform_1(%arg0: i32, %arg1: i32) -> (i32, i32, i32) {
    %c0_i32 = arith.constant 0 : i32
    %c0_i32_0 = arith.constant 0 : i32
    return %arg0, %c0_i32, %arg1 : i32, i32, i32
  }
  func.func @transform_2(%arg0: i32, %arg1: i32) -> (i32, i32, i32) {
    %c0_i32 = arith.constant 0 : i32
    %c0_i32_0 = arith.constant 0 : i32
    return %arg0, %c0_i32, %arg1 : i32, i32, i32
  }
  func.func @transform_3(%arg0: i32, %arg1: i32) -> (i32, i32) {
    %c0_i32 = arith.constant 0 : i32
    %c0_i32_0 = arith.constant 0 : i32
    return %arg0, %c0_i32 : i32, i32
  }
  func.func @transform_4(%arg0: i32, %arg1: i32) -> (i32, i32) {
    %c0_i32 = arith.constant 0 : i32
    %c0_i32_0 = arith.constant 0 : i32
    return %arg0, %c0_i32 : i32, i32
  }
  func.func @transform_5(%arg0: i32, %arg1: i32) -> (i32, i32, i32) {
    %c0_i32 = arith.constant 0 : i32
    %c0_i32_0 = arith.constant 0 : i32
    %c0_i32_1 = arith.constant 0 : i32
    return %arg0, %c0_i32, %c0_i32_0 : i32, i32, i32
  }
}

</mosaic_0001>

<bundles_post_ra>
// kernel: tpu_custom_call.1
= control target key start
LH: loop header
LB: loop body
LE: loop exit
PB: predicated region body
PF: predicated region fallthrough
CT: control target
= control target key end

     0   :  { %10 = vsyncpa [#allocation4], 0  ;;  %s403_s0 = inlined_call_operand.hbm [shape: f32[2,4,256], index: 0, kind: input, shape index: {}]   ;;  %s404_s1 = inlined_call_operand.hbm [shape: f32[2,4,256], index: 1, kind: input, shape index: {}]   ;;  %s405_s2 = inlined_call_operand.vmem [shape: f32[2,1,256], index: 2, kind: input, shape index: {}]   ;;  %s406_s3 = inlined_call_operand.vmem [shape: f32[2,32], index: 3, kind: input, shape index: {}]   ;;  %s407_s4 = inlined_call_operand.vmem [shape: f32[2,32], index: 4, kind: input, shape index: {}]   ;;  %s408_s5 = inlined_call_operand.hbm [shape: f32[1,8,128], index: 5, kind: output, shape index: {}]  }
   0x1   :  { %11 = vsyncpa [#allocation7], 0 }
   0x2   :  { %12 = vsyncpa [#allocation5], 0  ;;  %s312_s18 = smov [#allocation3]   ;;  %s240_s22 = scalar_lea.hbm %s403_s0, 256 }
   0x3   :  { %s18_s19 = sshll.u32 %s312_s18, 4  ;;  %p241_p0 = scmp.ne.s32.totalorder %s403_s0, %s240_s22  ;;  %s19_s19 = int_to_ptr.vmem [resolvable:$true] %s18_s19 }
   0x4   :  { %p244_p1 = scmp.lt.u32.totalorder %s240_s22, %s403_s0 }
   0x6   :  { %p246_p2 = pnand %p244_p1, %p241_p0 }
   0x8   :  { %249 = shalt.err (!%p246_p2)
}
   0x9   :  { %s250_s27 = scalar_lea.vmem %s19_s19, 256  ;;  %p255_p4 = scmp.lt.s32.totalorder %s19_s19, %s19_s19 }
   0xa   :  { %p251_p3 = scmp.ne.s32.totalorder %s19_s19, %s250_s27  ;;  %p256_p5 = scmp.lt.s32.totalorder %s250_s27, %s250_s27 }
   0xc   :  { %p257_p6 = por %p256_p5, %p255_p4 }
   0xe   :  { %p258_p7 = pnand %p257_p6, %p251_p3 }
  0x10   :  { %261 = shalt.err (!%p258_p7)
}
  0x11   :  { %s313_s28 = smov 128   ;;  %s314_s29 = smov 8  }
  0x12   :  { %24 = dma.hbm_to_vmem [thread:$0]  %s403_s0, 256, %s19_s19, [#allocation4], %s313_s28, %s313_s28, %s314_s29  }
  0x13   :  { %s315_s7 = smov [#allocation6]   ;;  %s262_s11 = scalar_lea.hbm %s404_s1, 256 }
  0x14   :  { %s30_s8 = sshll.u32 %s315_s7, 4  ;;  %p263_p8 = scmp.ne.s32.totalorder %s404_s1, %s262_s11  ;;  %s31_s8 = int_to_ptr.vmem [resolvable:$true] %s30_s8 }
  0x15   :  { %p266_p9 = scmp.lt.u32.totalorder %s262_s11, %s404_s1 }
  0x17   :  { %p268_p10 = pnand %p266_p9, %p263_p8 }
  0x19   :  { %271 = shalt.err (!%p268_p10)
}
  0x1a   :  { %s272_s16 = scalar_lea.vmem %s31_s8, 256  ;;  %p277_p12 = scmp.lt.s32.totalorder %s31_s8, %s31_s8 }
  0x1b   :  { %p273_p11 = scmp.ne.s32.totalorder %s31_s8, %s272_s16  ;;  %p278_p13 = scmp.lt.s32.totalorder %s272_s16, %s272_s16 }
  0x1d   :  { %p279_p0 = por %p278_p13, %p277_p12 }
  0x1f   :  { %p280_p1 = pnand %p279_p0, %p273_p11 }
  0x21   :  { %283 = shalt.err (!%p280_p1)
}
  0x22   :  { %36 = dma.hbm_to_vmem [thread:$0]  %s404_s1, 256, %s31_s8, [#allocation7], %s313_s28, %s313_s28, %s314_s29  }
  0x23   :  { %306 = dma.done.wait [#allocation4], 256  }
  0x24   :  { %307 = vsyncadd [#allocation4], 4294967040 }
  0x25   :  { %308 = dma.done.wait [#allocation7], 256  }
  0x26   :  { %309 = vsyncadd [#allocation7], 4294967040  ;;  %v83_v0 = vlaneseq  ;;  %v59_v2 = vld [vmem:[%s405_s2] sm:$0x3]  ;;  %v60_v3 = vld [vmem:[%s405_s2 + $0x2] sm:$0x3] }
  0x27   :  { %vm65_vm0 = vcmp.eq.f32.partialorder %v59_v2, 0.0  ;;  %vm66_vm1 = vcmp.eq.f32.partialorder %v60_v3, 0.0  ;;  %v71_v4 = vmul.f32 0.01, %v59_v2  ;;  %v316_v5 = vmov 0.0   ;;  %v55_v23 = vld [vmem:[#allocation3] sm:$0xff] }
  0x28   :  { %v84_v1 = vshrl.u32 %v83_v0, 7  ;;  %v215_v6 = vsel %vm65_vm0, 1.0, %v316_v5  ;;  %v216_v7 = vsel %vm66_vm1, 1.0, %v316_v5  ;;  %v72_v8 = vmul.f32 0.01, %v60_v3  ;;  %v57_v24 = vld [vmem:[#allocation6] sm:$0xff] }
  0x29   :  { %v73_v9 = vadd.f32 %v215_v6, %v71_v4  ;;  %v169_v15 = vld [vmem:[%s407_s4] sm:$0x3]  ;;  %v56_v25 = vld [vmem:[#allocation3 + $0x8] sm:$0xff]  ;;  %v61_v27 = vsub.f32 %v55_v23, %v57_v24  ;;  %vm144_vm2 = vcmask 1043456   ;;  %vm176_vm3 = vcmask 254976   ;;  %s317_s25 = smov [#allocation8]  }
  0x2a   :  { %v85_v10 = vsub.s32 0, %v84_v1  ;;  %v89_v11 = vsub.s32 1, %v84_v1  ;;  %v74_v12 = vadd.f32 %v216_v7, %v72_v8  ;;  %v170_v21 = vmul.f32 1.442695, %v169_v15  ;;  %v58_v26 = vld [vmem:[#allocation6 + $0x8] sm:$0xff]  ;;  %s205_s26 = sshll.u32 %s317_s25, 4  ;;  %s206_s26 = int_to_ptr.vmem [resolvable:$true] %s205_s26 }
  0x2b   :  { %v75_v13 = vmax.f32 %v73_v9, 1e-06  ;;  %v62_v28 = vsub.f32 %v56_v25, %v58_v26  ;;  %v63_v31 = vmul.f32 %v61_v27, %v61_v27  ;;  %v168_v35 = vld [vmem:[%s406_s3] sm:$0x3]  ;;  %vm53_vm4 = vcmask 0   ;;  %s284_s28 = scalar_lea.vmem %s206_s26, 128  ;;  %p289_p3 = scmp.lt.s32.totalorder %s206_s26, %s206_s26 }
  0x2c   :  { %v76_v14 = vmax.f32 %v74_v12, 1e-06  ;;  %v172_v42 = vmul.f32 %v168_v35, %v168_v35  ;;  %54 = vst.msk [vmem:[#allocation2] sm:$0x1] %vm53_vm4, %v316_v5  ;;  %p285_p2 = scmp.ne.s32.totalorder %s206_s26, %s284_s28  ;;  %p290_p4 = scmp.lt.s32.totalorder %s284_s28, %s284_s28 }
  0x2d   :  { %230 = vlog2.f32 %v75_v13  ;;  %v86_v16 = vrot.slane %v75_v13, %v85_v10  ;;  %v90_v17 = vrot.slane %v75_v13, %v89_v11  ;;  %v64_v33 = vmul.f32 %v62_v28, %v62_v28 }
  0x2e   :  { %232 = vlog2.f32 %v76_v14  ;;  %v94_v18 = vrot.slane %v76_v14, %v85_v10  ;;  %v98_v19 = vrot.slane %v76_v14, %v89_v11  ;;  %p291_p5 = por %p290_p4, %p289_p3 }
  0x2f   :  { %v99_v20 = vcombine.low %v86_v16, %v90_v17 }
  0x30   :  { %v100_v22 = vcombine.low %v94_v18, %v98_v19  ;;  %p292_p6 = pnand %p291_p5, %p285_p2 }
  0x31   :  { %234 = vrcp.f32 %v99_v20 }
  0x32   :  { %236 = vrcp.f32 %v100_v22  ;;  %v191_v22 = vand.u32 127, %v83_v0 }
  0x33   :  { %238 = vpow2.f32 %v170_v21  ;;  %v143_v19 = vld [vmem:[#allocation2] sm:$0x1] }
  0x34   :  { %vm193_vm5 = vcmp.eq.s32.totalorder %v191_v22, 1  ;;  %vm192_vm6 = vcmp.eq.s32.totalorder %v191_v22, 0 }
  0x37   :  { %v231_v29 = vpop.eup %230 }
  0x38   :  { %v233_v30 = vpop.eup %232  ;;  %v78_v32 = vmul.f32 0.6931472, %v231_v29 }
  0x39   :  { %v80_v34 = vmul.f32 0.6931472, %v233_v30 }
  0x3a   :  { %v112_v36 = vrot.slane %v78_v32, %v85_v10  ;;  %v116_v41 = vrot.slane %v78_v32, %v89_v11 }
  0x3b   :  { %v235_v37 = vpop.eup %234  ;;  %v120_v38 = vrot.slane %v80_v34, %v85_v10  ;;  %v124_v45 = vrot.slane %v80_v34, %v89_v11 }
  0x3c   :  { %v237_v39 = vpop.eup %236  ;;  %v104_v40 = vmul.f32 %v235_v37, %v63_v31 }
  0x3d   :  { %v239_v43 = vpop.eup %238  ;;  %v106_v44 = vmul.f32 %v237_v39, %v64_v33 }
  0x3e   :  { %v131_v46 = vcombine.high %v104_v40, %v104_v40  ;;  %v135_v47 = vadd.f32 %v112_v36, %v104_v40  ;;  %v173_v52 = vadd.f32 %v239_v43, %v172_v42 }
  0x3f   :  { %v132_v48 = vcombine.high %v106_v44, %v106_v44  ;;  %v137_v49 = vadd.f32 %v120_v38, %v106_v44 }
  0x40   :  { %v136_v50 = vadd.f32 %v131_v46, %v116_v41  ;;  %v139_v51 = vmul.f32 0.5, %v135_v47  ;;  %v217_v60 = vadd.f32 -1.0, %v173_v52 }
  0x41   :  { %v138_v53 = vadd.f32 %v132_v48, %v124_v45  ;;  %v141_v54 = vmul.f32 0.5, %v137_v49 }
  0x42   :  { %v140_v55 = vmul.f32 0.5, %v136_v50  ;;  %v145_v56 = vsel %vm144_vm2, %v139_v51, 0.0  ;;  %v175_v1 = vsub.f32 %v217_v60, %v169_v15 }
  0x43   :  { %v142_v57 = vmul.f32 0.5, %v138_v53  ;;  %v148_v59 = vsel %vm144_vm2, %v141_v54, 0.0 }
  0x44   :  { %v146_v58 = vsel %vm144_vm2, %v140_v55, 0.0  ;;  %v177_v3 = vsel %vm176_vm3, %v175_v1, 0.0 }
  0x45   :  { %v147_v61 = vadd.f32 %v146_v58, %v145_v56  ;;  %v150_v62 = vsel %vm144_vm2, %v142_v57, 0.0 }
  0x47   :  { %v149_v63 = vadd.f32 %v148_v59, %v147_v61 }
  0x49   :  { %v151_v2 = vadd.f32 %v150_v62, %v149_v63 }
  0x4b   :  { %152 = vadd.xlane.f32.xlu0 %v151_v2 }
  0x4f   :  { %178 = vadd.xlane.f32.xlu0 %v177_v3 }
  0xd8   :  { %v153_v4 = vpop.xlane.xlu0 %152 }
  0xd9   :  { %v154_v6 = vrot.slane %v153_v4, 4 }
  0xdb   :  { %v155_v7 = vadd.f32 %v154_v6, %v153_v4 }
  0xdc   :  { %v179_v8 = vpop.xlane.xlu0 %178 }
  0xdd   :  { %v156_v9 = vrot.slane %v155_v7, 2  ;;  %v180_v10 = vrot.slane %v179_v8, 4 }
  0xdf   :  { %v157_v11 = vadd.f32 %v156_v9, %v155_v7  ;;  %v181_v12 = vadd.f32 %v180_v10, %v179_v8 }
  0xe1   :  { %v158_v13 = vrot.slane %v157_v11, 1  ;;  %v182_v14 = vrot.slane %v181_v12, 2 }
  0xe3   :  { %v159_v15 = vadd.f32 %v158_v13, %v157_v11  ;;  %v183_v16 = vadd.f32 %v182_v14, %v181_v12 }
  0xe5   :  { %218 = vpush %v159_v15  ;;  %v184_v17 = vrot.slane %v183_v16, 1 }
  0xe7   :  { %v185_v18 = vadd.f32 %v184_v17, %v183_v16 }
  0xe9   :  { %220 = vpush %v185_v18 }
 0x116   :  { %s219_s3 = spop %218 }
 0x117   :  { %v161_v20 = vstv %s219_s3 }
 0x118   :  { %v162_v5 = vadd.f32 %v161_v20, %v143_v19 }
 0x11a   :  { %164 = vst.msk [vmem:[#allocation2] sm:$0x1] %vm53_vm4, %v162_v5  ;;  %s221_s23 = spop %220 }
 0x11b   :  { %s187_s24 = smul.f32 0.5, %s221_s23 }
 0x11d   :  { %v196_v24 = vstv %s187_s24 }
 0x121   :  { %v188_v21 = vld [vmem:[#allocation2] sm:$0x1] }
 0x122   :  { %222 = vpush %v188_v21 }
 0x153   :  { %s223_s27 = spop %222 }
 0x154   :  { %v194_v23 = vstv %s223_s27 }
 0x155   :  { %v195_v25 = vsel %vm193_vm5, %v194_v23, 0.0 }
 0x156   :  { %v197_v26 = vsel %vm192_vm6, %v196_v24, %v195_v25 }
 0x157   :  { %198 = vst [vmem:[#allocation8] sm:$0xff] %v197_v26 }
 0x158   :  { %295 = shalt.err (!%p292_p6)
}
 0x159   :  { %s296_s6 = scalar_lea.hbm %s408_s5, 128 }
 0x15a   :  { %p297_p7 = scmp.ne.s32.totalorder %s408_s5, %s296_s6  ;;  %p300_p8 = scmp.lt.u32.totalorder %s296_s6, %s408_s5 }
 0x15c   :  { %p302_p9 = pnand %p300_p8, %p297_p7 }
 0x15e   :  { %305 = shalt.err (!%p302_p9)
}
 0x15f   :  { %208 = dma.vmem_to_hbm [thread:$0]  %s206_s26, 128, %s408_s5, [#allocation5]  }
 0x160   :  { %310 = dma.done.wait [#allocation5], 128  }
 0x161   :  { %311 = vsyncadd [#allocation5], 4294967168 }
 0x162   :  { %212 = vsyncpa [#allocation4], 1 }
 0x163   :  { %213 = vsyncpa [#allocation7], 1 }
 0x164   :  { %214 = vsyncpa [#allocation5], 1 }

</bundles_post_ra>
